<compile_context>
chip_gen: v7x
topology: tpu7x:2x2x1
jax: 0.10.0
libtpu: 0.0.40
codegen_flags: <defaults>
</compile_context>

<pallas_src>
import functools

import numpy as np
import jax
import jax.numpy as jnp
from jax.experimental import pallas as pl
from jax.experimental.pallas import tpu as pltpu

ALPHA = -100.0     # module default
SEGMENT = 4        # args.timeseries.shaplet_segment (dist path reshapes to (4, -1))
_WL = 128          # lane width of the packed window grid


def _cdiv(a, b):
    return -(-a // b)


def _round_up(a, b):
    return _cdiv(a, b) * b


def _mask_mat():
    """Exact replica of SoftMinLayer.mask_mat (5x5, Sakoe-Chiba radius 1)."""
    l1 = 5
    radius = l1 // 5
    mask = np.full((l1, l1), np.inf, dtype=np.float32)
    width = radius
    for i in range(l1):
        lower = max(0, i - radius)
        upper = min(l1, i + width) + 1
        mask[i, lower:upper] = 0.0
    return mask


def _num_tensorcores():
    """2 only for v7x-class devices (2 TensorCores/chip); 1 for v5e/v6e/unknown."""
    try:
        kind = jax.devices()[0].device_kind.lower()
    except Exception:
        return 1
    return 2 if ("v7" in kind or "7x" in kind) else 1


def _make_kernel(seg, K, WS, WL, TPP, W, band_finite, alpha):
    """seg x seg banded DTW over WS*WL windows per grid step (windows packed 2-D)."""

    def kernel(x_ref, y_ref, o_ref):
        # x_ref: (L, WS, WL) VMEM; x_ref[r][s, l] = T[(row*WL + l)*step + r]
        # y_ref: (L,) SMEM (flattened shapelet, scalar reads)
        # o_ref: (8, WL) VMEM resident accumulator block for this partition
        p = pl.program_id(0)          # partition (CORE_PARALLEL on v7x, size 1 otherwise)
        t = pl.program_id(1)          # reduction over window tiles

        # ---- banded pairwise costs: direct sum_k (x - y)^2 on full (WS, WL) vregs ----
        costs = {}
        for i in range(seg):
            js = [j for j in range(seg) if band_finite[i, j]]
            acc = {j: None for j in js}
            for k in range(K):
                x_ik = x_ref[i * K + k]                      # (WS, WL) slab load
                for j in js:
                    diff = x_ik - y_ref[j * K + k]           # SMEM scalar broadcast
                    sq = diff * diff
                    acc[j] = sq if acc[j] is None else acc[j] + sq
            for j in js:
                costs[(i, j)] = acc[j]

        # ---- banded DTW DP, fully unrolled; every cell is a full (WS, WL) tile ----
        inf_s = jnp.full((WS, WL), jnp.inf, dtype=jnp.float32)
        zero_s = jnp.zeros((WS, WL), dtype=jnp.float32)
        prev = [zero_s] + [inf_s] * seg                      # cum[0, :]
        for i in range(seg):
            cur = [inf_s] * (seg + 1)                        # cum[i+1, 0] = inf
            for j in range(seg):
                if band_finite[i, j]:
                    best = jnp.minimum(jnp.minimum(prev[j + 1], cur[j]), prev[j])
                    cur[j + 1] = costs[(i, j)] + best
            prev = cur

        d = jnp.sqrt(prev[seg])                              # (WS, WL), >= 0 by construction
        xi = jnp.exp(np.float32(alpha) * d)                  # EUP

        # ---- mask windows beyond the real count W ----
        row0 = (p * TPP + t) * WS
        srow = jax.lax.broadcasted_iota(jnp.int32, (WS, WL), 0) + row0
        lane = jax.lax.broadcasted_iota(jnp.int32, (WS, WL), 1)
        widx = srow * WL + lane
        xi = jnp.where(widx < W, xi, jnp.float32(0.0))

        # ---- fold sublane groups of 8 (pure vreg adds) and accumulate into o_ref ----
        part = xi[0:8]
        for a in range(1, WS // 8):
            part = part + xi[a * 8:(a + 1) * 8]

        @pl.when(t == 0)
        def _():
            o_ref[...] = jnp.zeros_like(o_ref)

        o_ref[...] += part

    return kernel


@functools.partial(jax.jit, static_argnames=("segment", "alpha", "_force_max_rows"))
def soft_min_layer_forward(layer_input, sequence, segment=SEGMENT, alpha=ALPHA,
                           _force_max_rows=None):
    """Pallas implementation of SoftMinLayer.forward (dist_soft_min branch)."""
    S = jnp.ravel(sequence).astype(jnp.float32)
    T = jnp.ravel(layer_input).astype(jnp.float32)
    L = int(S.shape[0])
    Q = int(T.shape[0])
    if L % segment != 0 or L % 2 != 0:
        raise ValueError("shapelet length must be even and divisible by the segment count")
    step = L // 2
    K = L // segment
    J = Q - L
    if J < 1:
        raise ValueError("time series too short for a single window")
    W = _cdiv(J, step)                        # == len(range(0, J, step))

    # ---- tile / grid sizing against this generation's VMEM ------------------------
    WL = _WL
    rows_needed = _cdiv(W, WL)                # sublane rows of windows

    vmem_cap = 64 << 20
    try:
        vmem_cap = int(pltpu.get_tpu_info().vmem_capacity_bytes)
    except Exception:
        pass
    vmem_limit = max(32 << 20, min((vmem_cap * 3) // 4, 100 << 20))
    num_tc = _num_tensorcores()
    if num_tc == 2:                           # v7x: 64 MiB per TensorCore
        vmem_limit = min(vmem_limit, 48 << 20)

    # per window-row bytes: double-buffered X tile (2*L) + ~24 live (WS, WL) temporaries
    bytes_per_row = 4 * WL * (2 * L + 24)
    max_rows = int(vmem_limit * 0.6) // bytes_per_row
    max_rows = max(8, min(2048, (max_rows // 8) * 8))
    if _force_max_rows is not None:
        max_rows = int(_force_max_rows)

    NP = 2 if (num_tc == 2 and rows_needed >= 16) else 1
    rows_per_part = _cdiv(rows_needed, NP)
    TPP = _cdiv(rows_per_part, max_rows)      # window tiles per partition (reduction axis)
    WS = _round_up(_cdiv(rows_per_part, TPP), 8)
    SR = NP * TPP * WS                        # total padded sublane rows
    Wpad = SR * WL                            # total padded windows

    # ---- window slab (no gather): X[r, s, l] = T[(s*WL + l)*step + r] --------------
    need = (Wpad + 1) * step
    if need > Q:
        T_ext = jnp.pad(T, (0, need - Q))
    else:
        T_ext = T[:need]
    R = T_ext.reshape(Wpad + 1, step)
    Xw = jnp.concatenate([R[:-1], R[1:]], axis=1)      # (Wpad, L): window w = [R[w], R[w+1]]
    X = jnp.transpose(Xw).reshape(L, SR, WL)           # (L, SR, 128) packed window grid

    band_finite = np.isfinite(_mask_mat())[:segment, :segment]
    kernel = _make_kernel(segment, K, WS, WL, TPP, W, band_finite, alpha)

    sem0 = pltpu.CORE_PARALLEL if NP == 2 else pltpu.ARBITRARY

    out = pl.pallas_call(
        kernel,
        out_shape=jax.ShapeDtypeStruct((NP * 8, WL), jnp.float32),
        grid_spec=pltpu.PrefetchScalarGridSpec(
            num_scalar_prefetch=0,
            grid=(NP, TPP),
            in_specs=[
                pl.BlockSpec((L, WS, WL), lambda p, t: (0, p * TPP + t, 0)),
                pl.BlockSpec(memory_space=pltpu.MemorySpace.SMEM),   # shapelet scalars
            ],
            out_specs=pl.BlockSpec((8, WL), lambda p, t: (p, 0)),
        ),
        compiler_params=pltpu.CompilerParams(
            dimension_semantics=(sem0, pltpu.ARBITRARY),
            vmem_limit_bytes=int(vmem_limit),
        ),
    )(X, S)

    return jnp.sum(out) / jnp.float32(W)


def reference_forward(layer_input, sequence, segment=SEGMENT, alpha=ALPHA):
    """Pure numpy replica of the PyTorch dist_soft_min path (for verification)."""
    S = np.asarray(sequence, dtype=np.float64).ravel()
    T = np.asarray(layer_input, dtype=np.float64).ravel()
    L = len(S)
    Q = len(T)
    J = Q - L
    mask = _mask_mat()
    y = S.reshape(-1, int(L / segment))

    psi = 0.0
    it = 0
    for j in range(0, J, int(L / 2)):
        ts = T[j:j + L]
        x = ts.reshape(-1, int(len(ts) / segment))
        l1, l2 = x.shape[0], y.shape[0]
        cum = np.full((l1 + 1, l2 + 1), np.inf)
        cum[0, 0] = 0.0
        for i in range(l1):
            for jj in range(l2):
                if np.isfinite(mask[i, jj]):
                    cum[i + 1, jj + 1] = np.sum((x[i] - y[jj]) ** 2)
                    cum[i + 1, jj + 1] += min(cum[i, jj + 1], cum[i + 1, jj], cum[i, jj])
        d = np.sqrt(cum[-1, -1])
        psi += np.exp(alpha * d)
        it += 1
    return psi / it


if __name__ == "__main__":
    key = jax.random.PRNGKey(0)
    k_seq, k_inp = jax.random.split(key)

    L = 16            # shapelet length (divisible by SEGMENT=4, even)
    W_demo = 300      # sliding windows
    Q = L + (L // 2) * W_demo   # 2416 samples

    # small scale so exp(alpha * d) with alpha=-100 stays non-degenerate
    sequence = 0.01 * jax.random.normal(k_seq, (L,), dtype=jnp.float32)
    layer_input = 0.01 * jax.random.normal(k_inp, (Q,), dtype=jnp.float32)

    out = soft_min_layer_forward(layer_input, sequence)
    out = jax.block_until_ready(out)
    ref = reference_forward(np.asarray(layer_input), np.asarray(sequence))
    np.testing.assert_allclose(float(out), float(ref), rtol=1e-3, atol=1e-7)

    # second check: forces a multi-step reduction grid (exercises accumulation + masking)
    W2 = 1500
    Q2 = L + (L // 2) * W2
    layer_input2 = 0.01 * jax.random.normal(jax.random.PRNGKey(1), (Q2,), dtype=jnp.float32)
    out2 = jax.block_until_ready(
        soft_min_layer_forward(layer_input2, sequence, _force_max_rows=8))
    ref2 = reference_forward(np.asarray(layer_input2), np.asarray(sequence))
    np.testing.assert_allclose(float(out2), float(ref2), rtol=1e-3, atol=1e-7)

    print("KERNEL_OK")
</pallas_src>

<mosaic_0001>
module attributes {stable_mosaic.version = 11 : i64} {
  func.func @kernel(%arg0: i32, %arg1: i32, %arg2: memref<16x8x128xf32, #tpu.memory_space<vmem>>, %arg3: memref<16xf32, #tpu.memory_space<smem>>, %arg4: memref<8x128xf32, #tpu.memory_space<vmem>>) attributes {dimension_semantics = [#tpu.dimension_semantics<arbitrary>, #tpu.dimension_semantics<arbitrary>], iteration_bounds = array<i64: 1, 1>, scalar_prefetch = 0 : i64, scratch_operands = 0 : i64, tpu.core_type = #tpu.core_type<tc>, window_params = [{transform_indices = @transform_0, window_bounds = array<i64: 16, 8, 128>}, {transform_indices = @transform_1, window_bounds = array<i64: 16>}, {transform_indices = @transform_2, window_bounds = array<i64: 8, 128>}]} {
    %c0 = arith.constant 0 : index
    %c0_0 = arith.constant 0 : index
    %c0_1 = arith.constant 0 : index
    %0 = vector.load %arg2[%c0, %c0_0, %c0_1] : memref<16x8x128xf32, #tpu.memory_space<vmem>>, vector<1x8x128xf32>
    %1 = vector.shape_cast %0 : vector<1x8x128xf32> to vector<8x128xf32>
    %c0_2 = arith.constant 0 : index
    %2 = memref.load %arg3[%c0_2] : memref<16xf32, #tpu.memory_space<smem>>
    %3 = vector.broadcast %2 : f32 to vector<8x128xf32>
    %4 = arith.subf %1, %3 : vector<8x128xf32>
    %5 = arith.mulf %4, %4 : vector<8x128xf32>
    %c4 = arith.constant 4 : index
    %6 = memref.load %arg3[%c4] : memref<16xf32, #tpu.memory_space<smem>>
    %7 = vector.broadcast %6 : f32 to vector<8x128xf32>
    %8 = arith.subf %1, %7 : vector<8x128xf32>
    %9 = arith.mulf %8, %8 : vector<8x128xf32>
    %c1 = arith.constant 1 : index
    %c0_3 = arith.constant 0 : index
    %c0_4 = arith.constant 0 : index
    %10 = vector.load %arg2[%c1, %c0_3, %c0_4] : memref<16x8x128xf32, #tpu.memory_space<vmem>>, vector<1x8x128xf32>
    %11 = vector.shape_cast %10 : vector<1x8x128xf32> to vector<8x128xf32>
    %c1_5 = arith.constant 1 : index
    %12 = memref.load %arg3[%c1_5] : memref<16xf32, #tpu.memory_space<smem>>
    %13 = vector.broadcast %12 : f32 to vector<8x128xf32>
    %14 = arith.subf %11, %13 : vector<8x128xf32>
    %15 = arith.mulf %14, %14 : vector<8x128xf32>
    %16 = arith.addf %5, %15 : vector<8x128xf32>
    %c5 = arith.constant 5 : index
    %17 = memref.load %arg3[%c5] : memref<16xf32, #tpu.memory_space<smem>>
    %18 = vector.broadcast %17 : f32 to vector<8x128xf32>
    %19 = arith.subf %11, %18 : vector<8x128xf32>
    %20 = arith.mulf %19, %19 : vector<8x128xf32>
    %21 = arith.addf %9, %20 : vector<8x128xf32>
    %c2 = arith.constant 2 : index
    %c0_6 = arith.constant 0 : index
    %c0_7 = arith.constant 0 : index
    %22 = vector.load %arg2[%c2, %c0_6, %c0_7] : memref<16x8x128xf32, #tpu.memory_space<vmem>>, vector<1x8x128xf32>
    %23 = vector.shape_cast %22 : vector<1x8x128xf32> to vector<8x128xf32>
    %c2_8 = arith.constant 2 : index
    %24 = memref.load %arg3[%c2_8] : memref<16xf32, #tpu.memory_space<smem>>
    %25 = vector.broadcast %24 : f32 to vector<8x128xf32>
    %26 = arith.subf %23, %25 : vector<8x128xf32>
    %27 = arith.mulf %26, %26 : vector<8x128xf32>
    %28 = arith.addf %16, %27 : vector<8x128xf32>
    %c6 = arith.constant 6 : index
    %29 = memref.load %arg3[%c6] : memref<16xf32, #tpu.memory_space<smem>>
    %30 = vector.broadcast %29 : f32 to vector<8x128xf32>
    %31 = arith.subf %23, %30 : vector<8x128xf32>
    %32 = arith.mulf %31, %31 : vector<8x128xf32>
    %33 = arith.addf %21, %32 : vector<8x128xf32>
    %c3 = arith.constant 3 : index
    %c0_9 = arith.constant 0 : index
    %c0_10 = arith.constant 0 : index
    %34 = vector.load %arg2[%c3, %c0_9, %c0_10] : memref<16x8x128xf32, #tpu.memory_space<vmem>>, vector<1x8x128xf32>
    %35 = vector.shape_cast %34 : vector<1x8x128xf32> to vector<8x128xf32>
    %c3_11 = arith.constant 3 : index
    %36 = memref.load %arg3[%c3_11] : memref<16xf32, #tpu.memory_space<smem>>
    %37 = vector.broadcast %36 : f32 to vector<8x128xf32>
    %38 = arith.subf %35, %37 : vector<8x128xf32>
    %39 = arith.mulf %38, %38 : vector<8x128xf32>
    %40 = arith.addf %28, %39 : vector<8x128xf32>
    %c7 = arith.constant 7 : index
    %41 = memref.load %arg3[%c7] : memref<16xf32, #tpu.memory_space<smem>>
    %42 = vector.broadcast %41 : f32 to vector<8x128xf32>
    %43 = arith.subf %35, %42 : vector<8x128xf32>
    %44 = arith.mulf %43, %43 : vector<8x128xf32>
    %45 = arith.addf %33, %44 : vector<8x128xf32>
    %c4_12 = arith.constant 4 : index
    %c0_13 = arith.constant 0 : index
    %c0_14 = arith.constant 0 : index
    %46 = vector.load %arg2[%c4_12, %c0_13, %c0_14] : memref<16x8x128xf32, #tpu.memory_space<vmem>>, vector<1x8x128xf32>
    %47 = vector.shape_cast %46 : vector<1x8x128xf32> to vector<8x128xf32>
    %c0_15 = arith.constant 0 : index
    %48 = memref.load %arg3[%c0_15] : memref<16xf32, #tpu.memory_space<smem>>
    %49 = vector.broadcast %48 : f32 to vector<8x128xf32>
    %50 = arith.subf %47, %49 : vector<8x128xf32>
    %51 = arith.mulf %50, %50 : vector<8x128xf32>
    %c4_16 = arith.constant 4 : index
    %52 = memref.load %arg3[%c4_16] : memref<16xf32, #tpu.memory_space<smem>>
    %53 = vector.broadcast %52 : f32 to vector<8x128xf32>
    %54 = arith.subf %47, %53 : vector<8x128xf32>
    %55 = arith.mulf %54, %54 : vector<8x128xf32>
    %c8 = arith.constant 8 : index
    %56 = memref.load %arg3[%c8] : memref<16xf32, #tpu.memory_space<smem>>
    %57 = vector.broadcast %56 : f32 to vector<8x128xf32>
    %58 = arith.subf %47, %57 : vector<8x128xf32>
    %59 = arith.mulf %58, %58 : vector<8x128xf32>
    %c5_17 = arith.constant 5 : index
    %c0_18 = arith.constant 0 : index
    %c0_19 = arith.constant 0 : index
    %60 = vector.load %arg2[%c5_17, %c0_18, %c0_19] : memref<16x8x128xf32, #tpu.memory_space<vmem>>, vector<1x8x128xf32>
    %61 = vector.shape_cast %60 : vector<1x8x128xf32> to vector<8x128xf32>
    %c1_20 = arith.constant 1 : index
    %62 = memref.load %arg3[%c1_20] : memref<16xf32, #tpu.memory_space<smem>>
    %63 = vector.broadcast %62 : f32 to vector<8x128xf32>
    %64 = arith.subf %61, %63 : vector<8x128xf32>
    %65 = arith.mulf %64, %64 : vector<8x128xf32>
    %66 = arith.addf %51, %65 : vector<8x128xf32>
    %c5_21 = arith.constant 5 : index
    %67 = memref.load %arg3[%c5_21] : memref<16xf32, #tpu.memory_space<smem>>
    %68 = vector.broadcast %67 : f32 to vector<8x128xf32>
    %69 = arith.subf %61, %68 : vector<8x128xf32>
    %70 = arith.mulf %69, %69 : vector<8x128xf32>
    %71 = arith.addf %55, %70 : vector<8x128xf32>
    %c9 = arith.constant 9 : index
    %72 = memref.load %arg3[%c9] : memref<16xf32, #tpu.memory_space<smem>>
    %73 = vector.broadcast %72 : f32 to vector<8x128xf32>
    %74 = arith.subf %61, %73 : vector<8x128xf32>
    %75 = arith.mulf %74, %74 : vector<8x128xf32>
    %76 = arith.addf %59, %75 : vector<8x128xf32>
    %c6_22 = arith.constant 6 : index
    %c0_23 = arith.constant 0 : index
    %c0_24 = arith.constant 0 : index
    %77 = vector.load %arg2[%c6_22, %c0_23, %c0_24] : memref<16x8x128xf32, #tpu.memory_space<vmem>>, vector<1x8x128xf32>
    %78 = vector.shape_cast %77 : vector<1x8x128xf32> to vector<8x128xf32>
    %c2_25 = arith.constant 2 : index
    %79 = memref.load %arg3[%c2_25] : memref<16xf32, #tpu.memory_space<smem>>
    %80 = vector.broadcast %79 : f32 to vector<8x128xf32>
    %81 = arith.subf %78, %80 : vector<8x128xf32>
    %82 = arith.mulf %81, %81 : vector<8x128xf32>
    %83 = arith.addf %66, %82 : vector<8x128xf32>
    %c6_26 = arith.constant 6 : index
    %84 = memref.load %arg3[%c6_26] : memref<16xf32, #tpu.memory_space<smem>>
    %85 = vector.broadcast %84 : f32 to vector<8x128xf32>
    %86 = arith.subf %78, %85 : vector<8x128xf32>
    %87 = arith.mulf %86, %86 : vector<8x128xf32>
    %88 = arith.addf %71, %87 : vector<8x128xf32>
    %c10 = arith.constant 10 : index
    %89 = memref.load %arg3[%c10] : memref<16xf32, #tpu.memory_space<smem>>
    %90 = vector.broadcast %89 : f32 to vector<8x128xf32>
    %91 = arith.subf %78, %90 : vector<8x128xf32>
    %92 = arith.mulf %91, %91 : vector<8x128xf32>
    %93 = arith.addf %76, %92 : vector<8x128xf32>
    %c7_27 = arith.constant 7 : index
    %c0_28 = arith.constant 0 : index
    %c0_29 = arith.constant 0 : index
    %94 = vector.load %arg2[%c7_27, %c0_28, %c0_29] : memref<16x8x128xf32, #tpu.memory_space<vmem>>, vector<1x8x128xf32>
    %95 = vector.shape_cast %94 : vector<1x8x128xf32> to vector<8x128xf32>
    %c3_30 = arith.constant 3 : index
    %96 = memref.load %arg3[%c3_30] : memref<16xf32, #tpu.memory_space<smem>>
    %97 = vector.broadcast %96 : f32 to vector<8x128xf32>
    %98 = arith.subf %95, %97 : vector<8x128xf32>
    %99 = arith.mulf %98, %98 : vector<8x128xf32>
    %100 = arith.addf %83, %99 : vector<8x128xf32>
    %c7_31 = arith.constant 7 : index
    %101 = memref.load %arg3[%c7_31] : memref<16xf32, #tpu.memory_space<smem>>
    %102 = vector.broadcast %101 : f32 to vector<8x128xf32>
    %103 = arith.subf %95, %102 : vector<8x128xf32>
    %104 = arith.mulf %103, %103 : vector<8x128xf32>
    %105 = arith.addf %88, %104 : vector<8x128xf32>
    %c11 = arith.constant 11 : index
    %106 = memref.load %arg3[%c11] : memref<16xf32, #tpu.memory_space<smem>>
    %107 = vector.broadcast %106 : f32 to vector<8x128xf32>
    %108 = arith.subf %95, %107 : vector<8x128xf32>
    %109 = arith.mulf %108, %108 : vector<8x128xf32>
    %110 = arith.addf %93, %109 : vector<8x128xf32>
    %c8_32 = arith.constant 8 : index
    %c0_33 = arith.constant 0 : index
    %c0_34 = arith.constant 0 : index
    %111 = vector.load %arg2[%c8_32, %c0_33, %c0_34] : memref<16x8x128xf32, #tpu.memory_space<vmem>>, vector<1x8x128xf32>
    %112 = vector.shape_cast %111 : vector<1x8x128xf32> to vector<8x128xf32>
    %c4_35 = arith.constant 4 : index
    %113 = memref.load %arg3[%c4_35] : memref<16xf32, #tpu.memory_space<smem>>
    %114 = vector.broadcast %113 : f32 to vector<8x128xf32>
    %115 = arith.subf %112, %114 : vector<8x128xf32>
    %116 = arith.mulf %115, %115 : vector<8x128xf32>
    %c8_36 = arith.constant 8 : index
    %117 = memref.load %arg3[%c8_36] : memref<16xf32, #tpu.memory_space<smem>>
    %118 = vector.broadcast %117 : f32 to vector<8x128xf32>
    %119 = arith.subf %112, %118 : vector<8x128xf32>
    %120 = arith.mulf %119, %119 : vector<8x128xf32>
    %c12 = arith.constant 12 : index
    %121 = memref.load %arg3[%c12] : memref<16xf32, #tpu.memory_space<smem>>
    %122 = vector.broadcast %121 : f32 to vector<8x128xf32>
    %123 = arith.subf %112, %122 : vector<8x128xf32>
    %124 = arith.mulf %123, %123 : vector<8x128xf32>
    %c9_37 = arith.constant 9 : index
    %c0_38 = arith.constant 0 : index
    %c0_39 = arith.constant 0 : index
    %125 = vector.load %arg2[%c9_37, %c0_38, %c0_39] : memref<16x8x128xf32, #tpu.memory_space<vmem>>, vector<1x8x128xf32>
    %126 = vector.shape_cast %125 : vector<1x8x128xf32> to vector<8x128xf32>
    %c5_40 = arith.constant 5 : index
    %127 = memref.load %arg3[%c5_40] : memref<16xf32, #tpu.memory_space<smem>>
    %128 = vector.broadcast %127 : f32 to vector<8x128xf32>
    %129 = arith.subf %126, %128 : vector<8x128xf32>
    %130 = arith.mulf %129, %129 : vector<8x128xf32>
    %131 = arith.addf %116, %130 : vector<8x128xf32>
    %c9_41 = arith.constant 9 : index
    %132 = memref.load %arg3[%c9_41] : memref<16xf32, #tpu.memory_space<smem>>
    %133 = vector.broadcast %132 : f32 to vector<8x128xf32>
    %134 = arith.subf %126, %133 : vector<8x128xf32>
    %135 = arith.mulf %134, %134 : vector<8x128xf32>
    %136 = arith.addf %120, %135 : vector<8x128xf32>
    %c13 = arith.constant 13 : index
    %137 = memref.load %arg3[%c13] : memref<16xf32, #tpu.memory_space<smem>>
    %138 = vector.broadcast %137 : f32 to vector<8x128xf32>
    %139 = arith.subf %126, %138 : vector<8x128xf32>
    %140 = arith.mulf %139, %139 : vector<8x128xf32>
    %141 = arith.addf %124, %140 : vector<8x128xf32>
    %c10_42 = arith.constant 10 : index
    %c0_43 = arith.constant 0 : index
    %c0_44 = arith.constant 0 : index
    %142 = vector.load %arg2[%c10_42, %c0_43, %c0_44] : memref<16x8x128xf32, #tpu.memory_space<vmem>>, vector<1x8x128xf32>
    %143 = vector.shape_cast %142 : vector<1x8x128xf32> to vector<8x128xf32>
    %c6_45 = arith.constant 6 : index
    %144 = memref.load %arg3[%c6_45] : memref<16xf32, #tpu.memory_space<smem>>
    %145 = vector.broadcast %144 : f32 to vector<8x128xf32>
    %146 = arith.subf %143, %145 : vector<8x128xf32>
    %147 = arith.mulf %146, %146 : vector<8x128xf32>
    %148 = arith.addf %131, %147 : vector<8x128xf32>
    %c10_46 = arith.constant 10 : index
    %149 = memref.load %arg3[%c10_46] : memref<16xf32, #tpu.memory_space<smem>>
    %150 = vector.broadcast %149 : f32 to vector<8x128xf32>
    %151 = arith.subf %143, %150 : vector<8x128xf32>
    %152 = arith.mulf %151, %151 : vector<8x128xf32>
    %153 = arith.addf %136, %152 : vector<8x128xf32>
    %c14 = arith.constant 14 : index
    %154 = memref.load %arg3[%c14] : memref<16xf32, #tpu.memory_space<smem>>
    %155 = vector.broadcast %154 : f32 to vector<8x128xf32>
    %156 = arith.subf %143, %155 : vector<8x128xf32>
    %157 = arith.mulf %156, %156 : vector<8x128xf32>
    %158 = arith.addf %141, %157 : vector<8x128xf32>
    %c11_47 = arith.constant 11 : index
    %c0_48 = arith.constant 0 : index
    %c0_49 = arith.constant 0 : index
    %159 = vector.load %arg2[%c11_47, %c0_48, %c0_49] : memref<16x8x128xf32, #tpu.memory_space<vmem>>, vector<1x8x128xf32>
    %160 = vector.shape_cast %159 : vector<1x8x128xf32> to vector<8x128xf32>
    %c7_50 = arith.constant 7 : index
    %161 = memref.load %arg3[%c7_50] : memref<16xf32, #tpu.memory_space<smem>>
    %162 = vector.broadcast %161 : f32 to vector<8x128xf32>
    %163 = arith.subf %160, %162 : vector<8x128xf32>
    %164 = arith.mulf %163, %163 : vector<8x128xf32>
    %165 = arith.addf %148, %164 : vector<8x128xf32>
    %c11_51 = arith.constant 11 : index
    %166 = memref.load %arg3[%c11_51] : memref<16xf32, #tpu.memory_space<smem>>
    %167 = vector.broadcast %166 : f32 to vector<8x128xf32>
    %168 = arith.subf %160, %167 : vector<8x128xf32>
    %169 = arith.mulf %168, %168 : vector<8x128xf32>
    %170 = arith.addf %153, %169 : vector<8x128xf32>
    %c15 = arith.constant 15 : index
    %171 = memref.load %arg3[%c15] : memref<16xf32, #tpu.memory_space<smem>>
    %172 = vector.broadcast %171 : f32 to vector<8x128xf32>
    %173 = arith.subf %160, %172 : vector<8x128xf32>
    %174 = arith.mulf %173, %173 : vector<8x128xf32>
    %175 = arith.addf %158, %174 : vector<8x128xf32>
    %c12_52 = arith.constant 12 : index
    %c0_53 = arith.constant 0 : index
    %c0_54 = arith.constant 0 : index
    %176 = vector.load %arg2[%c12_52, %c0_53, %c0_54] : memref<16x8x128xf32, #tpu.memory_space<vmem>>, vector<1x8x128xf32>
    %177 = vector.shape_cast %176 : vector<1x8x128xf32> to vector<8x128xf32>
    %c8_55 = arith.constant 8 : index
    %178 = memref.load %arg3[%c8_55] : memref<16xf32, #tpu.memory_space<smem>>
    %179 = vector.broadcast %178 : f32 to vector<8x128xf32>
    %180 = arith.subf %177, %179 : vector<8x128xf32>
    %181 = arith.mulf %180, %180 : vector<8x128xf32>
    %c12_56 = arith.constant 12 : index
    %182 = memref.load %arg3[%c12_56] : memref<16xf32, #tpu.memory_space<smem>>
    %183 = vector.broadcast %182 : f32 to vector<8x128xf32>
    %184 = arith.subf %177, %183 : vector<8x128xf32>
    %185 = arith.mulf %184, %184 : vector<8x128xf32>
    %c13_57 = arith.constant 13 : index
    %c0_58 = arith.constant 0 : index
    %c0_59 = arith.constant 0 : index
    %186 = vector.load %arg2[%c13_57, %c0_58, %c0_59] : memref<16x8x128xf32, #tpu.memory_space<vmem>>, vector<1x8x128xf32>
    %187 = vector.shape_cast %186 : vector<1x8x128xf32> to vector<8x128xf32>
    %c9_60 = arith.constant 9 : index
    %188 = memref.load %arg3[%c9_60] : memref<16xf32, #tpu.memory_space<smem>>
    %189 = vector.broadcast %188 : f32 to vector<8x128xf32>
    %190 = arith.subf %187, %189 : vector<8x128xf32>
    %191 = arith.mulf %190, %190 : vector<8x128xf32>
    %192 = arith.addf %181, %191 : vector<8x128xf32>
    %c13_61 = arith.constant 13 : index
    %193 = memref.load %arg3[%c13_61] : memref<16xf32, #tpu.memory_space<smem>>
    %194 = vector.broadcast %193 : f32 to vector<8x128xf32>
    %195 = arith.subf %187, %194 : vector<8x128xf32>
    %196 = arith.mulf %195, %195 : vector<8x128xf32>
    %197 = arith.addf %185, %196 : vector<8x128xf32>
    %c14_62 = arith.constant 14 : index
    %c0_63 = arith.constant 0 : index
    %c0_64 = arith.constant 0 : index
    %198 = vector.load %arg2[%c14_62, %c0_63, %c0_64] : memref<16x8x128xf32, #tpu.memory_space<vmem>>, vector<1x8x128xf32>
    %199 = vector.shape_cast %198 : vector<1x8x128xf32> to vector<8x128xf32>
    %c10_65 = arith.constant 10 : index
    %200 = memref.load %arg3[%c10_65] : memref<16xf32, #tpu.memory_space<smem>>
    %201 = vector.broadcast %200 : f32 to vector<8x128xf32>
    %202 = arith.subf %199, %201 : vector<8x128xf32>
    %203 = arith.mulf %202, %202 : vector<8x128xf32>
    %204 = arith.addf %192, %203 : vector<8x128xf32>
    %c14_66 = arith.constant 14 : index
    %205 = memref.load %arg3[%c14_66] : memref<16xf32, #tpu.memory_space<smem>>
    %206 = vector.broadcast %205 : f32 to vector<8x128xf32>
    %207 = arith.subf %199, %206 : vector<8x128xf32>
    %208 = arith.mulf %207, %207 : vector<8x128xf32>
    %209 = arith.addf %197, %208 : vector<8x128xf32>
    %c15_67 = arith.constant 15 : index
    %c0_68 = arith.constant 0 : index
    %c0_69 = arith.constant 0 : index
    %210 = vector.load %arg2[%c15_67, %c0_68, %c0_69] : memref<16x8x128xf32, #tpu.memory_space<vmem>>, vector<1x8x128xf32>
    %211 = vector.shape_cast %210 : vector<1x8x128xf32> to vector<8x128xf32>
    %c11_70 = arith.constant 11 : index
    %212 = memref.load %arg3[%c11_70] : memref<16xf32, #tpu.memory_space<smem>>
    %213 = vector.broadcast %212 : f32 to vector<8x128xf32>
    %214 = arith.subf %211, %213 : vector<8x128xf32>
    %215 = arith.mulf %214, %214 : vector<8x128xf32>
    %216 = arith.addf %204, %215 : vector<8x128xf32>
    %c15_71 = arith.constant 15 : index
    %217 = memref.load %arg3[%c15_71] : memref<16xf32, #tpu.memory_space<smem>>
    %218 = vector.broadcast %217 : f32 to vector<8x128xf32>
    %219 = arith.subf %211, %218 : vector<8x128xf32>
    %220 = arith.mulf %219, %219 : vector<8x128xf32>
    %221 = arith.addf %209, %220 : vector<8x128xf32>
    %cst = arith.constant 0x7F800000 : f32
    %222 = vector.broadcast %cst : f32 to vector<8x128xf32>
    %cst_72 = arith.constant 0.000000e+00 : f32
    %223 = vector.broadcast %cst_72 : f32 to vector<8x128xf32>
    %224 = arith.minimumf %222, %222 : vector<8x128xf32>
    %225 = arith.minimumf %224, %223 : vector<8x128xf32>
    %226 = arith.addf %40, %225 : vector<8x128xf32>
    %227 = arith.minimumf %222, %226 : vector<8x128xf32>
    %228 = arith.minimumf %227, %222 : vector<8x128xf32>
    %229 = arith.addf %45, %228 : vector<8x128xf32>
    %230 = arith.minimumf %226, %222 : vector<8x128xf32>
    %231 = arith.minimumf %230, %222 : vector<8x128xf32>
    %232 = arith.addf %100, %231 : vector<8x128xf32>
    %233 = arith.minimumf %229, %232 : vector<8x128xf32>
    %234 = arith.minimumf %233, %226 : vector<8x128xf32>
    %235 = arith.addf %105, %234 : vector<8x128xf32>
    %236 = arith.minimumf %222, %235 : vector<8x128xf32>
    %237 = arith.minimumf %236, %229 : vector<8x128xf32>
    %238 = arith.addf %110, %237 : vector<8x128xf32>
    %239 = arith.minimumf %235, %222 : vector<8x128xf32>
    %240 = arith.minimumf %239, %232 : vector<8x128xf32>
    %241 = arith.addf %165, %240 : vector<8x128xf32>
    %242 = arith.minimumf %238, %241 : vector<8x128xf32>
    %243 = arith.minimumf %242, %235 : vector<8x128xf32>
    %244 = arith.addf %170, %243 : vector<8x128xf32>
    %245 = arith.minimumf %222, %244 : vector<8x128xf32>
    %246 = arith.minimumf %245, %238 : vector<8x128xf32>
    %247 = arith.addf %175, %246 : vector<8x128xf32>
    %248 = arith.minimumf %244, %222 : vector<8x128xf32>
    %249 = arith.minimumf %248, %241 : vector<8x128xf32>
    %250 = arith.addf %216, %249 : vector<8x128xf32>
    %251 = arith.minimumf %247, %250 : vector<8x128xf32>
    %252 = arith.minimumf %251, %244 : vector<8x128xf32>
    %253 = arith.addf %221, %252 : vector<8x128xf32>
    %254 = math.sqrt %253 : vector<8x128xf32>
    %cst_73 = arith.constant -1.000000e+02 : f32
    %255 = vector.broadcast %cst_73 : f32 to vector<8x128xf32>
    %256 = arith.mulf %255, %254 : vector<8x128xf32>
    %257 = math.exp %256 : vector<8x128xf32>
    %c1_i32 = arith.constant 1 : i32
    %258 = arith.muli %arg0, %c1_i32 : i32
    %259 = arith.addi %258, %arg1 : i32
    %c8_i32 = arith.constant 8 : i32
    %260 = arith.muli %259, %c8_i32 : i32
    %261 = tpu.iota {dimensions = array<i32: 0>} : vector<8x128xi32>
    %262 = vector.broadcast %260 : i32 to vector<8x128xi32>
    %263 = arith.addi %261, %262 : vector<8x128xi32>
    %264 = tpu.iota {dimensions = array<i32: 1>} : vector<8x128xi32>
    %c128_i32 = arith.constant 128 : i32
    %265 = vector.broadcast %c128_i32 : i32 to vector<8x128xi32>
    %266 = arith.muli %263, %265 : vector<8x128xi32>
    %267 = arith.addi %266, %264 : vector<8x128xi32>
    %c300_i32 = arith.constant 300 : i32
    %268 = vector.broadcast %c300_i32 : i32 to vector<8x128xi32>
    %269 = arith.cmpi slt, %267, %268 : vector<8x128xi32>
    %cst_74 = arith.constant 0.000000e+00 : f32
    %270 = vector.broadcast %cst_74 : f32 to vector<8x128xf32>
    %271 = arith.select %269, %257, %270 : vector<8x128xi1>, vector<8x128xf32>
    %c0_i32 = arith.constant 0 : i32
    %272 = arith.cmpi eq, %arg1, %c0_i32 : i32
    %273 = arith.extui %272 : i1 to i32
    %c0_i32_75 = arith.constant 0 : i32
    %274 = arith.cmpi ne, %273, %c0_i32_75 : i32
    scf.if %274 {
      %cst_80 = arith.constant 0.000000e+00 : f32
      %278 = vector.broadcast %cst_80 : f32 to vector<8x128xf32>
      %c0_81 = arith.constant 0 : index
      %c0_82 = arith.constant 0 : index
      %279 = vector.load %arg4[%c0_81, %c0_82] : memref<8x128xf32, #tpu.memory_space<vmem>>, vector<8x128xf32>
      tpu.vector_store %arg4[%c0_81, %c0_82], %278 {strides = array<i32>} : memref<8x128xf32, #tpu.memory_space<vmem>>, vector<8x128xf32>,
    } else {
    }
    %c0_76 = arith.constant 0 : index
    %c0_77 = arith.constant 0 : index
    %275 = vector.load %arg4[%c0_76, %c0_77] : memref<8x128xf32, #tpu.memory_space<vmem>>, vector<8x128xf32>
    %276 = arith.addf %275, %271 : vector<8x128xf32>
    %c0_78 = arith.constant 0 : index
    %c0_79 = arith.constant 0 : index
    %277 = vector.load %arg4[%c0_78, %c0_79] : memref<8x128xf32, #tpu.memory_space<vmem>>, vector<8x128xf32>
    tpu.vector_store %arg4[%c0_78, %c0_79], %276 {strides = array<i32>} : memref<8x128xf32, #tpu.memory_space<vmem>>, vector<8x128xf32>,
    return
  }
  func.func @transform_0(%arg0: i32, %arg1: i32) -> (i32, i32, i32) {
    %c1_i32 = arith.constant 1 : i32
    %0 = arith.muli %arg0, %c1_i32 : i32
    %1 = arith.addi %0, %arg1 : i32
    %c0_i32 = arith.constant 0 : i32
    %c0_i32_0 = arith.constant 0 : i32
    %c0_i32_1 = arith.constant 0 : i32
    return %c0_i32, %1, %c0_i32_0 : i32, i32, i32
  }
  func.func @transform_1(%arg0: i32, %arg1: i32) -> i32 {
    %c0_i32 = arith.constant 0 : i32
    %c0_i32_0 = arith.constant 0 : i32
    return %c0_i32 : i32
  }
  func.func @transform_2(%arg0: i32, %arg1: i32) -> (i32, i32) {
    %c0_i32 = arith.constant 0 : i32
    %c0_i32_0 = arith.constant 0 : i32
    return %arg0, %c0_i32 : i32, i32
  }
}

</mosaic_0001>

<bundles_post_ra>
// kernel: soft_min_layer_forward.1
= control target key start
LH: loop header
LB: loop body
LE: loop exit
PB: predicated region body
PF: predicated region fallthrough
CT: control target
= control target key end

     0   :  { %7 = vsyncpa [#allocation3], 0  ;;  %s442_s0 = inlined_call_operand.vmem [shape: f32[16,8,128], index: 0, kind: input, shape index: {}]   ;;  %s443_s1 = inlined_call_operand.vmem [shape: f32[16], index: 1, kind: input, shape index: {}]   ;;  %s444_s2 = inlined_call_operand.vmem [shape: f32[8,128], index: 2, kind: output, shape index: {}]  }
   0x1   :  { %s22_s11 = sshll.u32 %s443_s1, 4  ;;  %s23_s11 = int_to_ptr.vmem [resolvable:$true] %s22_s11 }
   0x2   :  { %s311_s12 = scalar_lea.vmem %s23_s11, 16  ;;  %p316_p1 = scmp.lt.s32.totalorder %s23_s11, %s23_s11 }
   0x3   :  { %p312_p0 = scmp.ne.s32.totalorder %s23_s11, %s311_s12  ;;  %p317_p2 = scmp.lt.s32.totalorder %s311_s12, %s311_s12 }
   0x5   :  { %p318_p3 = por %p317_p2, %p316_p1 }
   0x7   :  { %p319_p4 = pnand %p318_p3, %p312_p0 }
   0x9   :  { %322 = shalt.err (!%p319_p4)
}
   0xa   :  { %s325_s13 = smov [#allocation2]  }
   0xb   :  { %25 = dma.vmem_to_smem %s23_s11, 16, %s325_s13, [#allocation3]  }
   0xc   :  { %323 = dma.done.wait [#allocation3], 16  }
   0xd   :  { %324 = vsyncadd [#allocation3], 4294967280 }
   0xe   :  { %29 = sfence }
   0xf   :  { %s344_s14 = sld [smem:[#allocation2]]  ;;  %s277_s15 = sld [smem:[#allocation2 + $0x1]]  ;;  %v41_v0 = vld [vmem:[%s442_s0] sm:$0xff]  ;;  %v276_v2 = vld [vmem:[%s442_s0 + $0x8] sm:$0xff]  ;;  %v279_v8 = vld [vmem:[%s442_s0 + $0x10] sm:$0xff] }
  0x10   :  { %s275_s16 = sld [smem:[#allocation2 + $0x4]]  ;;  %s278_s17 = sld [smem:[#allocation2 + $0x5]]  ;;  %v285_v10 = vld [vmem:[%s442_s0 + $0x20] sm:$0xff]  ;;  %v287_v11 = vld [vmem:[%s442_s0 + $0x28] sm:$0xff]  ;;  %v282_v18 = vld [vmem:[%s442_s0 + $0x18] sm:$0xff] }
  0x11   :  { %s346_s1 = sld [smem:[#allocation2 + $0x2]]  ;;  %s281_s18 = sld [smem:[#allocation2 + $0x6]]  ;;  %v289_v26 = vld [vmem:[%s442_s0 + $0x30] sm:$0xff]  ;;  %v291_v40 = vld [vmem:[%s442_s0 + $0x38] sm:$0xff]  ;;  %v293_v48 = vld [vmem:[%s442_s0 + $0x40] sm:$0xff] }
  0x12   :  { %s355_s23 = sld [smem:[#allocation2 + $0x3]]  ;;  %s284_s24 = sld [smem:[#allocation2 + $0x7]]  ;;  %v295_v49 = vld [vmem:[%s442_s0 + $0x48] sm:$0xff]  ;;  %v297_v62 = vld [vmem:[%s442_s0 + $0x50] sm:$0xff] }
  0x13   :  { %s286_s29 = sld [smem:[#allocation2 + $0x8]]  ;;  %s288_s4 = sld [smem:[#allocation2 + $0x9]] }
  0x14   :  { %s371_s7 = sld [smem:[#allocation2 + $0xa]]  ;;  %s386_s12 = sld [smem:[#allocation2 + $0xb]] }
  0x15   :  { %v43_v1 = vstv %s344_s14  ;;  %v53_v3 = vstv %s277_s15  ;;  %s388_s13 = sld [smem:[#allocation2 + $0xc]]  ;;  %s390_s14 = sld [smem:[#allocation2 + $0xd]] }
  0x16   :  { %v44_v4 = vsub.f32 %v41_v0, %v43_v1  ;;  %v47_v5 = vstv %s275_s16  ;;  %v54_v6 = vsub.f32 %v276_v2, %v53_v3  ;;  %v58_v7 = vstv %s278_s17  ;;  %s407_s20 = sld [smem:[#allocation2 + $0xe]] }
  0x17   :  { %v65_v9 = vstv %s346_s1  ;;  %v48_v12 = vsub.f32 %v41_v0, %v47_v5  ;;  %v59_v13 = vsub.f32 %v276_v2, %v58_v7  ;;  %v70_v17 = vstv %s281_s18 }
  0x18   :  { %v45_v14 = vmul.f32 %v44_v4, %v44_v4  ;;  %v55_v15 = vmul.f32 %v54_v6, %v54_v6  ;;  %v66_v16 = vsub.f32 %v279_v8, %v65_v9  ;;  %v77_v19 = vstv %s355_s23  ;;  %s418_s23 = sld [smem:[#allocation2 + $0xf]] }
  0x19   :  { %v88_v20 = vsub.f32 %v285_v10, %v43_v1  ;;  %v98_v21 = vsub.f32 %v287_v11, %v53_v3  ;;  %v49_v22 = vmul.f32 %v48_v12, %v48_v12  ;;  %v60_v23 = vmul.f32 %v59_v13, %v59_v13 }
  0x1a   :  { %v71_v24 = vsub.f32 %v279_v8, %v70_v17  ;;  %v373_v25 = vstv %s284_s24  ;;  %v56_v27 = vadd.f32 %v55_v15, %v45_v14  ;;  %v67_v28 = vmul.f32 %v66_v16, %v66_v16  ;;  %v299_v15 = vld [vmem:[%s442_s0 + $0x58] sm:$0xff] }
  0x1b   :  { %v78_v29 = vsub.f32 %v282_v18, %v77_v19  ;;  %v90_v30 = vsub.f32 %v285_v10, %v47_v5  ;;  %v89_v31 = vmul.f32 %v88_v20, %v88_v20  ;;  %v99_v32 = vmul.f32 %v98_v21, %v98_v21 }
  0x1c   :  { %v101_v33 = vsub.f32 %v287_v11, %v58_v7  ;;  %v378_v34 = vstv %s286_s29  ;;  %v380_v35 = vstv %s288_s4  ;;  %v111_v36 = vsub.f32 %v289_v26, %v65_v9 }
  0x1d   :  { %v61_v37 = vadd.f32 %v60_v23, %v49_v22  ;;  %v72_v38 = vmul.f32 %v71_v24, %v71_v24  ;;  %v83_v39 = vsub.f32 %v282_v18, %v373_v25  ;;  %v68_v41 = vadd.f32 %v67_v28, %v56_v27  ;;  %v302_v23 = vld [vmem:[%s442_s0 + $0x68] sm:$0xff] }
  0x1e   :  { %v79_v42 = vmul.f32 %v78_v29, %v78_v29  ;;  %v91_v43 = vmul.f32 %v90_v30, %v90_v30  ;;  %v94_v44 = vsub.f32 %v285_v10, %v378_v34  ;;  %v100_v45 = vadd.f32 %v99_v32, %v89_v31 }
  0x1f   :  { %v102_v46 = vmul.f32 %v101_v33, %v101_v33  ;;  %v106_v47 = vsub.f32 %v287_v11, %v380_v35  ;;  %v112_v50 = vmul.f32 %v111_v36, %v111_v36  ;;  %v114_v51 = vsub.f32 %v289_v26, %v70_v17 }
  0x20   :  { %v401_v52 = vstv %s371_s7  ;;  %v124_v53 = vsub.f32 %v291_v40, %v77_v19  ;;  %v73_v54 = vadd.f32 %v72_v38, %v61_v37  ;;  %v84_v55 = vmul.f32 %v83_v39, %v83_v39 }
  0x21   :  { %v137_v56 = vsub.f32 %v293_v48, %v47_v5  ;;  %v147_v57 = vsub.f32 %v295_v49, %v58_v7  ;;  %v80_v58 = vadd.f32 %v79_v42, %v68_v41  ;;  %v95_v59 = vmul.f32 %v94_v44, %v94_v44 }
  0x22   :  { %v107_v60 = vmul.f32 %v106_v47, %v106_v47  ;;  %v119_v61 = vsub.f32 %v289_v26, %v401_v52  ;;  %v103_v63 = vadd.f32 %v102_v46, %v91_v43  ;;  %v113_v0 = vadd.f32 %v112_v50, %v100_v45 }
  0x23   :  { %v115_v1 = vmul.f32 %v114_v51, %v114_v51  ;;  %v125_v2 = vmul.f32 %v124_v53, %v124_v53  ;;  %v85_v3 = vadd.f32 %v84_v55, %v73_v54  ;;  %v127_v4 = vsub.f32 %v291_v40, %v373_v25  ;;  %v304_v53 = vld [vmem:[%s442_s0 + $0x78] sm:$0xff] }
  0x24   :  { %v131_v5 = vstv %s386_s12  ;;  %v142_v6 = vstv %s388_s13  ;;  %v138_v7 = vmul.f32 %v137_v56, %v137_v56  ;;  %v148_v8 = vmul.f32 %v147_v57, %v147_v57 }
  0x25   :  { %v154_v9 = vstv %s390_s14  ;;  %v160_v10 = vsub.f32 %v297_v62, %v70_v17  ;;  %v108_v11 = vadd.f32 %v107_v60, %v95_v59  ;;  %v120_v12 = vmul.f32 %v119_v61, %v119_v61  ;;  %v301_v17 = vld [vmem:[%s442_s0 + $0x60] sm:$0xff] }
  0x26   :  { %v139_v13 = vsub.f32 %v293_v48, %v378_v34  ;;  %v150_v14 = vsub.f32 %v295_v49, %v380_v35  ;;  %v116_v16 = vadd.f32 %v115_v1, %v103_v63  ;;  %v126_v18 = vadd.f32 %v125_v2, %v113_v0 }
  0x27   :  { %v128_v19 = vmul.f32 %v127_v4, %v127_v4  ;;  %v132_v20 = vsub.f32 %v291_v40, %v131_v5  ;;  %v143_v21 = vsub.f32 %v293_v48, %v142_v6  ;;  %v155_v22 = vsub.f32 %v295_v49, %v154_v9 }
  0x28   :  { %v149_v24 = vadd.f32 %v148_v8, %v138_v7  ;;  %v161_v26 = vmul.f32 %v160_v10, %v160_v10  ;;  %v173_v27 = vsub.f32 %v299_v15, %v373_v25  ;;  %v215_v28 = vadd.f32 %v85_v3, %v80_v58  ;;  %v303_v25 = vld [vmem:[%s442_s0 + $0x70] sm:$0xff] }
  0x29   :  { %v121_v29 = vadd.f32 %v120_v12, %v108_v11  ;;  %v140_v30 = vmul.f32 %v139_v13, %v139_v13  ;;  %v151_v31 = vmul.f32 %v150_v14, %v150_v14  ;;  %v163_v32 = vsub.f32 %v297_v62, %v401_v52 }
  0x2a   :  { %v167_v33 = vstv %s407_s20  ;;  %v186_v36 = vsub.f32 %v301_v17, %v378_v34  ;;  %v192_v37 = vsub.f32 %v302_v23, %v380_v35  ;;  %v216_v38 = vadd.f32 %v126_v18, %v80_v58 }
  0x2b   :  { %v129_v39 = vadd.f32 %v128_v19, %v116_v16  ;;  %v133_v40 = vmul.f32 %v132_v20, %v132_v20  ;;  %v144_v41 = vmul.f32 %v143_v21, %v143_v21  ;;  %v176_v42 = vsub.f32 %v299_v15, %v131_v5 }
  0x2c   :  { %v156_v43 = vmul.f32 %v155_v22, %v155_v22  ;;  %v162_v44 = vadd.f32 %v161_v26, %v149_v24  ;;  %v174_v45 = vmul.f32 %v173_v27, %v173_v27  ;;  %v217_v46 = vmin.f32 %v215_v28, %v216_v38 }
  0x2d   :  { %v152_v47 = vadd.f32 %v151_v31, %v140_v30  ;;  %v164_v48 = vmul.f32 %v163_v32, %v163_v32  ;;  %v168_v49 = vsub.f32 %v297_v62, %v167_v33  ;;  %v180_v50 = vstv %s418_s23 }
  0x2e   :  { %v187_v34 = vmul.f32 %v186_v36, %v186_v36  ;;  %v193_v51 = vmul.f32 %v192_v37, %v192_v37  ;;  %v200_v35 = vsub.f32 %v303_v25, %v401_v52  ;;  %v218_v54 = vmin.f32 %v217_v46, %v80_v58 }
  0x2f   :  { %v134_v55 = vadd.f32 %v133_v40, %v121_v29  ;;  %v177_v56 = vmul.f32 %v176_v42, %v176_v42  ;;  %v188_v57 = vsub.f32 %v301_v17, %v142_v6  ;;  %v157_v59 = vadd.f32 %v156_v43, %v144_v41 }
  0x30   :  { %v175_v60 = vadd.f32 %v174_v45, %v162_v44  ;;  %v195_v61 = vsub.f32 %v302_v23, %v154_v9  ;;  %v219_v63 = vadd.f32 %v218_v54, %v129_v39  ;;  %v165_v0 = vadd.f32 %v164_v48, %v152_v47 }
  0x31   :  { %v169_v1 = vmul.f32 %v168_v49, %v168_v49  ;;  %v181_v62 = vsub.f32 %v299_v15, %v180_v50  ;;  %v208_v2 = vsub.f32 %v304_v53, %v131_v5  ;;  %v194_v3 = vadd.f32 %v193_v51, %v187_v34 }
  0x32   :  { %v201_v4 = vmul.f32 %v200_v35, %v200_v35  ;;  %v220_v7 = vmin.f32 %v219_v63, %v215_v28  ;;  %v222_v52 = vmin.f32 %v219_v63, %v216_v38  ;;  %v189_v8 = vmul.f32 %v188_v57, %v188_v57 }
  0x33   :  { %v196_v10 = vmul.f32 %v195_v61, %v195_v61  ;;  %v203_v11 = vsub.f32 %v303_v25, %v167_v33  ;;  %v178_v13 = vadd.f32 %v177_v56, %v165_v0  ;;  %v182_v14 = vmul.f32 %v181_v62, %v181_v62 }
  0x34   :  { %v221_v12 = vadd.f32 %v220_v7, %v134_v55  ;;  %v223_v58 = vadd.f32 %v222_v52, %v175_v60  ;;  %v170_v6 = vadd.f32 %v169_v1, %v157_v59  ;;  %v202_v16 = vadd.f32 %v201_v4, %v194_v3 }
  0x35   :  { %v209_v18 = vmul.f32 %v208_v2, %v208_v2  ;;  %v197_v19 = vadd.f32 %v196_v10, %v189_v8  ;;  %v204_v20 = vmul.f32 %v203_v11, %v203_v11  ;;  %v211_v21 = vsub.f32 %v304_v53, %v180_v50 }
  0x36   :  { %v224_v9 = vmin.f32 %v221_v12, %v223_v58  ;;  %v183_v5 = vadd.f32 %v182_v14, %v170_v6  ;;  %v246_v39 = vlaneseq }
  0x37   :  { %v210_v22 = vadd.f32 %v209_v18, %v202_v16  ;;  %v205_v23 = vadd.f32 %v204_v20, %v197_v19  ;;  %v212_v24 = vmul.f32 %v211_v21, %v211_v21 }
  0x38   :  { %v225_v15 = vmin.f32 %v224_v9, %v219_v63  ;;  %v247_v25 = vshrl.u32 %v246_v39, 7  ;;  %v251_v44 = vand.u32 127, %v246_v39 }
  0x39   :  { %v213_v30 = vadd.f32 %v212_v24, %v205_v23 }
  0x3a   :  { %v226_v17 = vadd.f32 %v225_v15, %v178_v13  ;;  %v252_v45 = vmul.u32 128, %v247_v25 }
  0x3c   :  { %v227_v26 = vmin.f32 %v226_v17, %v221_v12  ;;  %v229_v27 = vmin.f32 %v226_v17, %v223_v58  ;;  %v253_v46 = vadd.s32 %v252_v45, %v251_v44 }
  0x3e   :  { %v228_v28 = vadd.f32 %v227_v26, %v183_v5  ;;  %v230_v29 = vadd.f32 %v229_v27, %v210_v22  ;;  %vm254_vm2 = vcmp.lt.s32.totalorder %v253_v46, 300 }
  0x40   :  { %v231_v31 = vmin.f32 %v228_v28, %v230_v29 }
  0x42   :  { %v232_v32 = vmin.f32 %v231_v31, %v226_v17 }
  0x44   :  { %v233_v33 = vadd.f32 %v232_v32, %v213_v30 }
  0x46   :  { %307 = vrsqrt.f32 %v233_v33  ;;  %vm236_vm0 = vcmp.eq.f32.partialorder %v233_v33, inf  ;;  %v239_v37 = vand.u32 2147483648, %v233_v33  ;;  %vm238_vm1 = vcmp.eq.f32.partialorder %v233_v33, 0.0 }
  0x50   :  { %v308_v36 = vpop.eup %307 }
  0x51   :  { %v235_v38 = vmul.f32 %v308_v36, %v233_v33 }
  0x53   :  { %v237_v40 = vsel %vm236_vm0, %v233_v33, %v235_v38 }
  0x54   :  { %v240_v41 = vsel %vm238_vm1, %v239_v37, %v237_v40 }
  0x55   :  { %v241_v42 = vmul.f32 -100.0, %v240_v41 }
  0x57   :  { %v242_v43 = vmul.f32 1.442695, %v241_v42 }
  0x59   :  { %309 = vpow2.f32 %v242_v43 }
  0x63   :  { %v310_v47 = vpop.eup %309 }
  0x64   :  { %v255_v48 = vsel %vm254_vm2, %v310_v47, 0.0 }
  0x65   :  { %263 = vst [vmem:[%s444_s2] sm:$0xff] %v255_v48 }
  0x66   :  { %268 = vsyncpa [#allocation3], 1 }

</bundles_post_ra>
